<compile_context>
chip_gen: v7x
topology: tpu7x:2x2x1
jax: 0.10.0
libtpu: 0.0.40
codegen_flags: <defaults>
</compile_context>

<pallas_src>
import functools

import jax
import jax.numpy as jnp
from jax.experimental import pallas as pl
from jax.experimental.pallas import tpu as pltpu


# ----------------------------------------------------------------------------
# Helpers
# ----------------------------------------------------------------------------
def _pick_tile(dim, target):
    """Largest multiple of 128 that divides `dim` and is <= target."""
    assert dim % 128 == 0, "feature dims must be multiples of 128"
    t = min(dim, target)
    t -= t % 128
    while dim % t != 0:
        t -= 128
    return t


def _pad_rows(x, multiple=8):
    """Pad the batch (sublane) axis up to a multiple of 8 rows."""
    r = x.shape[0]
    rp = ((r + multiple - 1) // multiple) * multiple
    if rp == r:
        return x
    return jnp.pad(x, ((0, rp - r), (0, 0)))


# ----------------------------------------------------------------------------
# Fused linear (+ optional ReLU) kernel:  y = act(x @ W + b)
#   x: [B, K] f32 (VMEM-resident)   W: [K, N] bf16/f32 (streamed)
#   b: [1, N] f32 (VMEM-resident)   y: [B, N] f32 (accumulated in place)
# Grid: (N // tn, K // tk); K is the reduction axis (last, "arbitrary").
# ----------------------------------------------------------------------------
def _linear_kernel(x_ref, w_ref, b_ref, o_ref, *, apply_relu, tk, tn):
    j = pl.program_id(0)           # output-feature (N) tile
    k = pl.program_id(1)           # reduction (K) tile
    nk = pl.num_programs(1)

    # k == 0: seed the (k-resident) output tile with the broadcast bias.
    @pl.when(k == 0)
    def _():
        b_tile = b_ref[:, pl.ds(pl.multiple_of(j * tn, 128), tn)]      # (1, tn)
        o_ref[...] = jnp.broadcast_to(b_tile, o_ref.shape)

    # x stays resident across the whole grid; slice the current K chunk.
    x_tile = x_ref[:, pl.ds(pl.multiple_of(k * tk, 128), tk)]          # (B, tk)
    o_ref[...] += jnp.dot(
        x_tile.astype(w_ref.dtype), w_ref[...],
        preferred_element_type=jnp.float32,
    )

    if apply_relu:
        @pl.when(k == nk - 1)
        def _():
            o_ref[...] = jnp.maximum(o_ref[...], 0.0)


def pallas_linear(x, w, b, *, apply_relu, tn_target=512, tk_target=2048):
    """y = act(x @ w + b) with x:[B,K] f32, w:[K,N], b:[N]."""
    B, K = x.shape
    Kw, N = w.shape
    assert K == Kw and b.shape == (N,)
    assert B % 8 == 0, "pad the batch to a multiple of 8 sublanes"

    tk = _pick_tile(K, tk_target)
    tn = _pick_tile(N, tn_target)

    b2 = b.reshape(1, N).astype(jnp.float32)
    kernel = functools.partial(_linear_kernel, apply_relu=apply_relu, tk=tk, tn=tn)

    return pl.pallas_call(
        kernel,
        out_shape=jax.ShapeDtypeStruct((B, N), jnp.float32),
        grid_spec=pltpu.PrefetchScalarGridSpec(
            num_scalar_prefetch=0,
            grid=(N // tn, K // tk),
            in_specs=[
                pl.BlockSpec((B, K), lambda j, k: (0, 0)),     # x: resident
                pl.BlockSpec((tk, tn), lambda j, k: (k, j)),   # W: streamed
                pl.BlockSpec((1, N), lambda j, k: (0, 0)),     # b: resident
            ],
            out_specs=pl.BlockSpec((B, tn), lambda j, k: (0, j)),
        ),
        compiler_params=pltpu.CompilerParams(
            dimension_semantics=("parallel", "arbitrary"),
            vmem_limit_bytes=64 * 1024 * 1024,
        ),
    )(x, w, b2)


# ----------------------------------------------------------------------------
# CorrectionNet
# ----------------------------------------------------------------------------
def init_params(key, d_in, h, d_out, dtype=jnp.float32):
    """Deterministic synthetic parameters (PyTorch Linear shapes: W[out,in])."""
    ks = jax.random.split(key, 8)

    def lin(kw, kb, fan_in, fan_out):
        bound = 1.0 / jnp.sqrt(fan_in)
        w = jax.random.uniform(kw, (fan_out, fan_in), dtype, -bound, bound)
        b = jax.random.uniform(kb, (fan_out,), dtype, -bound, bound)
        return w, b

    return {
        "fc1": lin(ks[0], ks[1], d_in, h),
        "fc2": lin(ks[2], ks[3], d_in, h),      # unused in forward (as in PyTorch)
        "fc3": lin(ks[4], ks[5], 2 * h, 2 * h),
        "fc4": lin(ks[6], ks[7], 2 * h, d_out),
    }


def correction_net_forward(params, x0, x1, weight_dtype=jnp.bfloat16):
    w1, b1 = params["fc1"]
    w3, b3 = params["fc3"]
    w4, b4 = params["fc4"]
    # Glue: PyTorch [out,in] -> [in,out], weights cast to bf16 (f32 accumulation
    # happens inside the kernel).  fc2 exists in the module but is never used.
    w1t = w1.T.astype(weight_dtype)
    w3t = w3.T.astype(weight_dtype)
    w4t = w4.T.astype(weight_dtype)

    B = x0.shape[0]
    # Fused fc1: stack x0/x1 along the batch axis so the SHARED fc1 weights
    # stream from HBM exactly once; pad rows to full sublanes.
    xc = _pad_rows(jnp.concatenate([x0, x1], axis=0))            # [ceil8(2B), D_IN]
    hc = pallas_linear(xc, w1t, b1, apply_relu=True)             # relu(fc1([x0;x1]))
    h = jnp.concatenate([hc[:B], hc[B:2 * B]], axis=1)           # [B, 2H]
    h = _pad_rows(h)                                             # [ceil8(B), 2H]
    h = pallas_linear(h, w3t, b3, apply_relu=True)               # relu(fc3(h))
    y = pallas_linear(h, w4t, b4, apply_relu=False)              # fc4(h)
    return y[:B]


def reference_forward(params, x0, x1, weight_dtype=jnp.bfloat16):
    """Pure-JAX reference mirroring the kernel's bf16-weight / f32-accum choice."""
    def lin(x, w, b, relu):
        wt = w.T.astype(weight_dtype).astype(jnp.float32)
        xb = x.astype(weight_dtype).astype(jnp.float32)
        y = xb @ wt + b
        return jnp.maximum(y, 0.0) if relu else y

    h0 = lin(x0, *params["fc1"], True)
    h1 = lin(x1, *params["fc1"], True)
    h = jnp.concatenate([h0, h1], axis=1)
    h = lin(h, *params["fc3"], True)
    return lin(h, *params["fc4"], False)


if __name__ == "__main__":
    # Scaled-down dims (original: D_IN=59136, H=1024, D_OUT=59136).
    B, D_IN, H = 2, 1024, 256
    D_OUT = D_IN

    key = jax.random.PRNGKey(0)
    kp, k0, k1 = jax.random.split(key, 3)
    params = init_params(kp, D_IN, H, D_OUT)
    x0 = jax.random.normal(k0, (B, D_IN), jnp.float32)
    x1 = jax.random.normal(k1, (B, D_IN), jnp.float32)

    y = correction_net_forward(params, x0, x1)
    jax.block_until_ready(y)

    y_ref = reference_forward(params, x0, x1)
    assert y.shape == (B, D_OUT)
    assert jnp.allclose(y, y_ref, atol=1e-2, rtol=1e-2), float(
        jnp.max(jnp.abs(y - y_ref))
    )

    print("KERNEL_OK")
</pallas_src>

<mosaic_0001>
module attributes {stable_mosaic.version = 11 : i64} {
  func.func @_linear_kernel(%arg0: i32, %arg1: i32, %arg2: memref<8x1024xf32, #tpu.memory_space<vmem>>, %arg3: memref<1024x256xbf16, #tpu.memory_space<vmem>>, %arg4: memref<1x256xf32, #tpu.memory_space<vmem>>, %arg5: memref<8x256xf32, #tpu.memory_space<vmem>>) attributes {dimension_semantics = [#tpu.dimension_semantics<parallel>, #tpu.dimension_semantics<arbitrary>], iteration_bounds = array<i64: 1, 1>, scalar_prefetch = 0 : i64, scratch_operands = 0 : i64, tpu.core_type = #tpu.core_type<tc>, window_params = [{pipeline_mode = #tpu.pipeline_mode<synchronous>, transform_indices = @transform_0, window_bounds = array<i64: 8, 1024>}, {transform_indices = @transform_1, window_bounds = array<i64: 1024, 256>}, {pipeline_mode = #tpu.pipeline_mode<synchronous>, transform_indices = @transform_2, window_bounds = array<i64: 1, 256>}, {transform_indices = @transform_3, window_bounds = array<i64: 8, 256>}]} {
    %c0_i32 = arith.constant 0 : i32
    %0 = arith.cmpi eq, %arg1, %c0_i32 : i32
    %1 = arith.extui %0 : i1 to i32
    %c0_i32_0 = arith.constant 0 : i32
    %2 = arith.cmpi ne, %1, %c0_i32_0 : i32
    scf.if %2 {
      %c256_i32 = arith.constant 256 : i32
      %16 = arith.muli %arg0, %c256_i32 : i32
      %17 = tpu.assume_multiple %16, 128 : i32
      %c0_9 = arith.constant 0 : index
      %18 = arith.index_cast %17 : i32 to index
      %19 = vector.load %arg4[%c0_9, %18] : memref<1x256xf32, #tpu.memory_space<vmem>>, vector<1x256xf32>
      %20 = vector.shape_cast %19 : vector<1x256xf32> to vector<1x256xf32>
      %21 = vector.broadcast %20 : vector<1x256xf32> to vector<8x256xf32>
      %c0_10 = arith.constant 0 : index
      %c0_11 = arith.constant 0 : index
      %22 = vector.load %arg5[%c0_10, %c0_11] : memref<8x256xf32, #tpu.memory_space<vmem>>, vector<8x256xf32>
      tpu.vector_store %arg5[%c0_10, %c0_11], %21 {strides = array<i32>} : memref<8x256xf32, #tpu.memory_space<vmem>>, vector<8x256xf32>,
    } else {
    }
    %c1024_i32 = arith.constant 1024 : i32
    %3 = arith.muli %arg1, %c1024_i32 : i32
    %4 = tpu.assume_multiple %3, 128 : i32
    %c0 = arith.constant 0 : index
    %5 = arith.index_cast %4 : i32 to index
    %6 = vector.load %arg2[%c0, %5] : memref<8x1024xf32, #tpu.memory_space<vmem>>, vector<8x1024xf32>
    %c0_1 = arith.constant 0 : index
    %c0_2 = arith.constant 0 : index
    %7 = vector.load %arg5[%c0_1, %c0_2] : memref<8x256xf32, #tpu.memory_space<vmem>>, vector<8x256xf32>
    %8 = arith.truncf %6 : vector<8x1024xf32> to vector<8x1024xbf16>
    %c0_3 = arith.constant 0 : index
    %c0_4 = arith.constant 0 : index
    %9 = vector.load %arg3[%c0_3, %c0_4] : memref<1024x256xbf16, #tpu.memory_space<vmem>>, vector<1024x256xbf16>
    %cst = arith.constant dense<0.000000e+00> : vector<8x256xf32>
    %10 = tpu.matmul %8, %9, %cst {dimension_numbers = #tpu.dot_dimension_numbers<[1], [0], [0], [1], [0, 0, 1, 1], [], []>} : vector<8x1024xbf16>, vector<1024x256xbf16>, vector<8x256xf32> -> vector<8x256xf32>
    %11 = arith.addf %7, %10 : vector<8x256xf32>
    %c0_5 = arith.constant 0 : index
    %c0_6 = arith.constant 0 : index
    %12 = vector.load %arg5[%c0_5, %c0_6] : memref<8x256xf32, #tpu.memory_space<vmem>>, vector<8x256xf32>
    tpu.vector_store %arg5[%c0_5, %c0_6], %11 {strides = array<i32>} : memref<8x256xf32, #tpu.memory_space<vmem>>, vector<8x256xf32>,
    %c0_i32_7 = arith.constant 0 : i32
    %13 = arith.cmpi eq, %arg1, %c0_i32_7 : i32
    %14 = arith.extui %13 : i1 to i32
    %c0_i32_8 = arith.constant 0 : i32
    %15 = arith.cmpi ne, %14, %c0_i32_8 : i32
    scf.if %15 {
      %c0_9 = arith.constant 0 : index
      %c0_10 = arith.constant 0 : index
      %16 = vector.load %arg5[%c0_9, %c0_10] : memref<8x256xf32, #tpu.memory_space<vmem>>, vector<8x256xf32>
      %cst_11 = arith.constant 0.000000e+00 : f32
      %17 = vector.broadcast %cst_11 : f32 to vector<8x256xf32>
      %18 = arith.maximumf %16, %17 : vector<8x256xf32>
      %c0_12 = arith.constant 0 : index
      %c0_13 = arith.constant 0 : index
      %19 = vector.load %arg5[%c0_12, %c0_13] : memref<8x256xf32, #tpu.memory_space<vmem>>, vector<8x256xf32>
      tpu.vector_store %arg5[%c0_12, %c0_13], %18 {strides = array<i32>} : memref<8x256xf32, #tpu.memory_space<vmem>>, vector<8x256xf32>,
    } else {
    }
    return
  }
  func.func @transform_0(%arg0: i32, %arg1: i32) -> (i32, i32) {
    %c0_i32 = arith.constant 0 : i32
    %c0_i32_0 = arith.constant 0 : i32
    %c0_i32_1 = arith.constant 0 : i32
    return %c0_i32, %c0_i32_0 : i32, i32
  }
  func.func @transform_1(%arg0: i32, %arg1: i32) -> (i32, i32) {
    %c0_i32 = arith.constant 0 : i32
    return %arg1, %arg0 : i32, i32
  }
  func.func @transform_2(%arg0: i32, %arg1: i32) -> (i32, i32) {
    %c0_i32 = arith.constant 0 : i32
    %c0_i32_0 = arith.constant 0 : i32
    %c0_i32_1 = arith.constant 0 : i32
    return %c0_i32, %c0_i32_0 : i32, i32
  }
  func.func @transform_3(%arg0: i32, %arg1: i32) -> (i32, i32) {
    %c0_i32 = arith.constant 0 : i32
    %c0_i32_0 = arith.constant 0 : i32
    return %c0_i32, %arg0 : i32, i32
  }
}

</mosaic_0001>

<bundles_post_ra>
// kernel: tpu_custom_call.1
= control target key start
LH: loop header
LB: loop body
LE: loop exit
PB: predicated region body
PF: predicated region fallthrough
CT: control target
= control target key end

     0   :  { %8 = vsyncpa [#allocation3], 0  ;;  %s1555_s0 = inlined_call_operand.hbm [shape: f32[8,1024], index: 0, kind: input, shape index: {}]   ;;  %s1556_s1 = inlined_call_operand.hbm [shape: bf16[1024,256], index: 1, kind: input, shape index: {}]   ;;  %s1557_s2 = inlined_call_operand.hbm [shape: f32[1,256], index: 2, kind: input, shape index: {}]   ;;  %s1558_s3 = inlined_call_operand.hbm [shape: f32[8,256], index: 3, kind: output, shape index: {}]  }
   0x1   :  { %9 = vsyncpa [#allocation6], 0 }
   0x2   :  { %10 = vsyncpa [#allocation4], 0  ;;  %s1481_s12 = smov [#allocation5]   ;;  %s1387_s16 = scalar_lea.hbm %s1556_s1, 16384 }
   0x3   :  { %s26_s13 = sshll.u32 %s1481_s12, 4  ;;  %p1388_p0 = scmp.ne.s32.totalorder %s1556_s1, %s1387_s16  ;;  %s27_s13 = int_to_ptr.vmem [resolvable:$true] %s26_s13 }
   0x4   :  { %p1391_p1 = scmp.lt.u32.totalorder %s1387_s16, %s1556_s1 }
   0x6   :  { %p1393_p2 = pnand %p1391_p1, %p1388_p0 }
   0x8   :  { %1396 = shalt.err (!%p1393_p2)
}
   0x9   :  { %s1397_s21 = scalar_lea.vmem %s27_s13, 16384  ;;  %p1402_p4 = scmp.lt.s32.totalorder %s27_s13, %s27_s13 }
   0xa   :  { %p1398_p3 = scmp.ne.s32.totalorder %s27_s13, %s1397_s21  ;;  %p1403_p5 = scmp.lt.s32.totalorder %s1397_s21, %s1397_s21 }
   0xc   :  { %p1404_p6 = por %p1403_p5, %p1402_p4 }
   0xe   :  { %p1405_p7 = pnand %p1404_p6, %p1398_p3 }
  0x10   :  { %1408 = shalt.err (!%p1405_p7)
}
  0x11   :  { %s1482_s22 = smov 128   ;;  %s1483_s23 = smov 8  }
  0x12   :  { %32 = dma.hbm_to_vmem [thread:$0]  %s1556_s1, 16384, %s27_s13, [#allocation6], %s1482_s22, %s1482_s22, %s1483_s23  }
  0x13   :  { %s1484_s26 = smov [#allocation2]   ;;  %s1485_s28 = smov [#allocation7]  }
  0x14   :  { %s17_s27 = sshll.u32 %s1484_s26, 4  ;;  %s39_s29 = sshll.u32 %s1485_s28, 4  ;;  %s18_s27 = int_to_ptr.vmem [resolvable:$true] %s17_s27  ;;  %s40_s29 = int_to_ptr.vmem [resolvable:$true] %s39_s29 }
  0x15   :  { %s1409_s5 = scalar_lea.hbm %s1555_s0, 1024 }
  0x16   :  { %p1410_p8 = scmp.ne.s32.totalorder %s1555_s0, %s1409_s5  ;;  %p1413_p9 = scmp.lt.u32.totalorder %s1409_s5, %s1555_s0 }
  0x18   :  { %p1415_p10 = pnand %p1413_p9, %p1410_p8 }
  0x1a   :  { %1418 = shalt.err (!%p1415_p10)
}
  0x1b   :  { %s1419_s1 = scalar_lea.vmem %s18_s27, 1024  ;;  %p1424_p12 = scmp.lt.s32.totalorder %s18_s27, %s18_s27 }
  0x1c   :  { %p1420_p11 = scmp.ne.s32.totalorder %s18_s27, %s1419_s1  ;;  %p1425_p13 = scmp.lt.s32.totalorder %s1419_s1, %s1419_s1 }
  0x1e   :  { %p1426_p0 = por %p1425_p13, %p1424_p12 }
  0x20   :  { %p1427_p1 = pnand %p1426_p0, %p1420_p11 }
  0x22   :  { %1430 = shalt.err (!%p1427_p1)
}
  0x23   :  { %20 = dma.hbm_to_vmem [thread:$0]  %s1555_s0, 1024, %s18_s27, [#allocation3]  }
  0x24   :  { %s1431_s14 = scalar_lea.hbm %s1557_s2, 32 }
  0x25   :  { %p1432_p2 = scmp.ne.s32.totalorder %s1557_s2, %s1431_s14  ;;  %p1435_p3 = scmp.lt.u32.totalorder %s1431_s14, %s1557_s2 }
  0x27   :  { %p1437_p4 = pnand %p1435_p3, %p1432_p2 }
  0x29   :  { %1440 = shalt.err (!%p1437_p4)
}
  0x2a   :  { %s1441_s19 = scalar_lea.vmem %s40_s29, 32  ;;  %p1446_p6 = scmp.lt.s32.totalorder %s40_s29, %s40_s29 }
  0x2b   :  { %p1442_p5 = scmp.ne.s32.totalorder %s40_s29, %s1441_s19  ;;  %p1447_p7 = scmp.lt.s32.totalorder %s1441_s19, %s1441_s19 }
  0x2d   :  { %p1448_p8 = por %p1447_p7, %p1446_p6 }
  0x2f   :  { %p1449_p9 = pnand %p1448_p8, %p1442_p5 }
  0x31   :  { %1452 = shalt.err (!%p1449_p9)
}
  0x32   :  { %42 = dma.hbm_to_vmem [thread:$0]  %s1557_s2, 32, %s40_s29, [#allocation6]  }
  0x33   :  { %1475 = dma.done.wait [#allocation3], 1024  }
  0x34   :  { %1476 = vsyncadd [#allocation3], 4294966272 }
  0x35   :  { %1477 = dma.done.wait [#allocation6], 16416  }
  0x36   :  { %1478 = vsyncadd [#allocation6], 4294950880  ;;  %v1195_v0 = vld [vmem:[#allocation5 + $0x4] ss:$8 sps:$4 sm:$0xff]   ;;  %v1199_v2 = vld [vmem:[#allocation5] ss:$8 sps:$4 sm:$0xff]  }
  0x37   :  { %v1197_v1 = vld [vmem:[#allocation5 + $0x104] ss:$8 sps:$4 sm:$0xff]   ;;  %865 = vmatprep.subr.bf16.mxu0 %v1195_v0  ;;  %v1200_v3 = vld [vmem:[#allocation5 + $0x100] ss:$8 sps:$4 sm:$0xff]   ;;  %v1201_v4 = vld [vmem:[#allocation5 + $0x14] ss:$8 sps:$4 sm:$0xff]  }
  0x38   :  { %906 = vmatprep.subr.bf16.mxu1 %v1197_v1  ;;  %866 = vmatpush1.bf16.msra.mxu0 %v1199_v2  ;;  %v1203_v5 = vld [vmem:[#allocation5 + $0x114] ss:$8 sps:$4 sm:$0xff]   ;;  %v1205_v6 = vld [vmem:[#allocation5 + $0x10] ss:$8 sps:$4 sm:$0xff]   ;;  %v1207_v8 = vld [vmem:[#allocation5 + $0x24] ss:$8 sps:$4 sm:$0xff]  }
  0x39   :  { %907 = vmatpush1.bf16.msra.mxu1 %v1200_v3  ;;  %867 = vmatprep.subr.bf16.mxu0 %v1201_v4  ;;  %v1206_v7 = vld [vmem:[#allocation5 + $0x110] ss:$8 sps:$4 sm:$0xff]   ;;  %v1209_v9 = vld [vmem:[#allocation5 + $0x124] ss:$8 sps:$4 sm:$0xff]   ;;  %v1211_v10 = vld [vmem:[#allocation5 + $0x20] ss:$8 sps:$4 sm:$0xff]  }
  0x3a   :  { %908 = vmatprep.subr.bf16.mxu1 %v1203_v5  ;;  %v1212_v11 = vld [vmem:[#allocation5 + $0x120] ss:$8 sps:$4 sm:$0xff]   ;;  %v1213_v12 = vld [vmem:[#allocation5 + $0x34] ss:$8 sps:$4 sm:$0xff]   ;;  %v1217_v14 = vld [vmem:[#allocation5 + $0x30] ss:$8 sps:$4 sm:$0xff]  }
  0x3b   :  { %v1215_v13 = vld [vmem:[#allocation5 + $0x134] ss:$8 sps:$4 sm:$0xff]   ;;  %v1218_v15 = vld [vmem:[#allocation5 + $0x130] ss:$8 sps:$4 sm:$0xff]   ;;  %v1219_v16 = vld [vmem:[#allocation5 + $0x44] ss:$8 sps:$4 sm:$0xff]  }
  0x3c   :  { %868 = vmatpush1.bf16.msra.mxu0 %v1205_v6  ;;  %v1221_v17 = vld [vmem:[#allocation5 + $0x144] ss:$8 sps:$4 sm:$0xff]   ;;  %v1223_v18 = vld [vmem:[#allocation5 + $0x40] ss:$8 sps:$4 sm:$0xff]   ;;  %v1225_v20 = vld [vmem:[#allocation5 + $0x54] ss:$8 sps:$4 sm:$0xff]  }
  0x3d   :  { %909 = vmatpush1.bf16.msra.mxu1 %v1206_v7  ;;  %869 = vmatprep.subr.bf16.mxu0 %v1207_v8  ;;  %v1224_v19 = vld [vmem:[#allocation5 + $0x140] ss:$8 sps:$4 sm:$0xff]   ;;  %v1227_v21 = vld [vmem:[#allocation5 + $0x154] ss:$8 sps:$4 sm:$0xff]   ;;  %v1229_v22 = vld [vmem:[#allocation5 + $0x50] ss:$8 sps:$4 sm:$0xff]  }
  0x3e   :  { %910 = vmatprep.subr.bf16.mxu1 %v1209_v9  ;;  %v1230_v23 = vld [vmem:[#allocation5 + $0x150] ss:$8 sps:$4 sm:$0xff]   ;;  %v1231_v24 = vld [vmem:[#allocation5 + $0x64] ss:$8 sps:$4 sm:$0xff]   ;;  %v1235_v26 = vld [vmem:[#allocation5 + $0x60] ss:$8 sps:$4 sm:$0xff]  }
  0x3f   :  { %v1233_v25 = vld [vmem:[#allocation5 + $0x164] ss:$8 sps:$4 sm:$0xff]   ;;  %v1236_v27 = vld [vmem:[#allocation5 + $0x160] ss:$8 sps:$4 sm:$0xff]   ;;  %v1237_v28 = vld [vmem:[#allocation5 + $0x74] ss:$8 sps:$4 sm:$0xff]  }
  0x40   :  { %870 = vmatpush1.bf16.msra.mxu0 %v1211_v10  ;;  %v1239_v29 = vld [vmem:[#allocation5 + $0x174] ss:$8 sps:$4 sm:$0xff]   ;;  %v1241_v30 = vld [vmem:[#allocation5 + $0x70] ss:$8 sps:$4 sm:$0xff]   ;;  %v1243_v32 = vld [vmem:[#allocation5 + $0x84] ss:$8 sps:$4 sm:$0xff]  }
  0x41   :  { %911 = vmatpush1.bf16.msra.mxu1 %v1212_v11  ;;  %871 = vmatprep.subr.bf16.mxu0 %v1213_v12  ;;  %v1242_v31 = vld [vmem:[#allocation5 + $0x170] ss:$8 sps:$4 sm:$0xff]   ;;  %v1245_v33 = vld [vmem:[#allocation5 + $0x184] ss:$8 sps:$4 sm:$0xff]   ;;  %v1247_v34 = vld [vmem:[#allocation5 + $0x80] ss:$8 sps:$4 sm:$0xff]  }
  0x42   :  { %912 = vmatprep.subr.bf16.mxu1 %v1215_v13  ;;  %v1248_v35 = vld [vmem:[#allocation5 + $0x180] ss:$8 sps:$4 sm:$0xff]   ;;  %v1249_v36 = vld [vmem:[#allocation5 + $0x94] ss:$8 sps:$4 sm:$0xff]   ;;  %v1253_v38 = vld [vmem:[#allocation5 + $0x90] ss:$8 sps:$4 sm:$0xff]  }
  0x43   :  { %v1251_v37 = vld [vmem:[#allocation5 + $0x194] ss:$8 sps:$4 sm:$0xff]   ;;  %v1254_v39 = vld [vmem:[#allocation5 + $0x190] ss:$8 sps:$4 sm:$0xff]   ;;  %v1255_v40 = vld [vmem:[#allocation5 + $0xa4] ss:$8 sps:$4 sm:$0xff]  }
  0x44   :  { %872 = vmatpush1.bf16.msra.mxu0 %v1217_v14  ;;  %v1257_v41 = vld [vmem:[#allocation5 + $0x1a4] ss:$8 sps:$4 sm:$0xff]   ;;  %v1259_v42 = vld [vmem:[#allocation5 + $0xa0] ss:$8 sps:$4 sm:$0xff]   ;;  %v1261_v44 = vld [vmem:[#allocation5 + $0xb4] ss:$8 sps:$4 sm:$0xff]  }
  0x45   :  { %913 = vmatpush1.bf16.msra.mxu1 %v1218_v15  ;;  %873 = vmatprep.subr.bf16.mxu0 %v1219_v16  ;;  %v1260_v43 = vld [vmem:[#allocation5 + $0x1a0] ss:$8 sps:$4 sm:$0xff]   ;;  %v1263_v45 = vld [vmem:[#allocation5 + $0x1b4] ss:$8 sps:$4 sm:$0xff]   ;;  %v1265_v47 = vld [vmem:[#allocation5 + $0xb0] ss:$8 sps:$4 sm:$0xff]  }
  0x46   :  { %914 = vmatprep.subr.bf16.mxu1 %v1221_v17  ;;  %v80_v46 = vld [vmem:[#allocation2 + $0x8] sm:$0xff]  ;;  %v1266_v48 = vld [vmem:[#allocation5 + $0x1b0] ss:$8 sps:$4 sm:$0xff]   ;;  %v1273_v56 = vld [vmem:[#allocation5 + $0xd4] ss:$8 sps:$4 sm:$0xff]   ;;  %s1486_s2 = smov [#allocation8]  }
  0x47   :  { %v90_v49 = vpack.c.bf16 %v80_v46, %v80_v46  ;;  %v82_v50 = vld [vmem:[#allocation2 + $0x18] sm:$0xff]  ;;  %v1267_v51 = vld [vmem:[#allocation5 + $0xc4] ss:$8 sps:$4 sm:$0xff]   ;;  %v1271_v54 = vld [vmem:[#allocation5 + $0xc0] ss:$8 sps:$4 sm:$0xff]   ;;  %s1048_s21 = sshll.u32 %s1486_s2, 4  ;;  %s1049_s21 = int_to_ptr.vmem [resolvable:$true] %s1048_s21 }
  0x48   :  { %874 = vmatpush1.bf16.msra.mxu0 %v1223_v18  ;;  %v92_v52 = vpack.c.bf16 %v82_v50, %v82_v50  ;;  %v1269_v53 = vld [vmem:[#allocation5 + $0x1c4] ss:$8 sps:$4 sm:$0xff]   ;;  %v1272_v55 = vld [vmem:[#allocation5 + $0x1c0] ss:$8 sps:$4 sm:$0xff]   ;;  %v1275_v57 = vld [vmem:[#allocation5 + $0x1d4] ss:$8 sps:$4 sm:$0xff]   ;;  %p1458_p11 = scmp.lt.s32.totalorder %s1049_s21, %s1049_s21 }
  0x49   :  { %915 = vmatpush1.bf16.msra.mxu1 %v1224_v19  ;;  %875 = vmatprep.subr.bf16.mxu0 %v1225_v20  ;;  %v1277_v58 = vld [vmem:[#allocation5 + $0xd0] ss:$8 sps:$4 sm:$0xff]   ;;  %v1279_v60 = vld [vmem:[#allocation5 + $0xe4] ss:$8 sps:$4 sm:$0xff]   ;;  %v1283_v62 = vld [vmem:[#allocation5 + $0xe0] ss:$8 sps:$4 sm:$0xff]  }
  0x4a   :  { %916 = vmatprep.subr.bf16.mxu1 %v1227_v21  ;;  %897 = vmatprep.mubr.bf16.mxu0 %v90_v49  ;;  %v1278_v59 = vld [vmem:[#allocation5 + $0x1d0] ss:$8 sps:$4 sm:$0xff]   ;;  %v1281_v61 = vld [vmem:[#allocation5 + $0x1e4] ss:$8 sps:$4 sm:$0xff]   ;;  %v1284_v63 = vld [vmem:[#allocation5 + $0x1e0] ss:$8 sps:$4 sm:$0xff]  }
  0x4b   :  { %938 = vmatprep.mubr.bf16.mxu1 %v92_v52  ;;  %v1285_v0 = vld [vmem:[#allocation5 + $0xf4] ss:$8 sps:$4 sm:$0xff]   ;;  %v1289_v2 = vld [vmem:[#allocation5 + $0xf0] ss:$8 sps:$4 sm:$0xff]   ;;  %v79_v4 = vld [vmem:[#allocation2] sm:$0xff]  ;;  %s1453_s22 = scalar_lea.vmem %s1049_s21, 256 }
  0x4c   :  { %876 = vmatpush1.bf16.msra.mxu0 %v1229_v22  ;;  %v1287_v1 = vld [vmem:[#allocation5 + $0x1f4] ss:$8 sps:$4 sm:$0xff]   ;;  %v1290_v3 = vld [vmem:[#allocation5 + $0x1f0] ss:$8 sps:$4 sm:$0xff]   ;;  %v1293_v6 = vld [vmem:[#allocation5 + $0x204] ss:$8 sps:$4 sm:$0xff]   ;;  %v89_v8 = vpack.c.bf16 %v79_v4, %v79_v4  ;;  %p1454_p10 = scmp.ne.s32.totalorder %s1049_s21, %s1453_s22  ;;  %p1459_p12 = scmp.lt.s32.totalorder %s1453_s22, %s1453_s22 }
  0x4d   :  { %917 = vmatpush1.bf16.msra.mxu1 %v1230_v23  ;;  %877 = vmatprep.subr.bf16.mxu0 %v1231_v24  ;;  %v81_v5 = vld [vmem:[#allocation2 + $0x10] sm:$0xff]  ;;  %v1296_v7 = vld [vmem:[#allocation5 + $0x304] ss:$8 sps:$4 sm:$0xff]   ;;  %v1291_v10 = vld [vmem:[#allocation5 + $0x200] ss:$8 sps:$4 sm:$0xff]  }
  0x4e   :  { %918 = vmatprep.subr.bf16.mxu1 %v1233_v25  ;;  %v91_v9 = vpack.c.bf16 %v81_v5, %v81_v5  ;;  %v1294_v11 = vld [vmem:[#allocation5 + $0x300] ss:$8 sps:$4 sm:$0xff]   ;;  %v1299_v12 = vld [vmem:[#allocation5 + $0x214] ss:$8 sps:$4 sm:$0xff]   ;;  %v1297_v14 = vld [vmem:[#allocation5 + $0x210] ss:$8 sps:$4 sm:$0xff]   ;;  %p1460_p13 = por %p1459_p12, %p1458_p11 }
  0x4f   :  { %v1302_v13 = vld [vmem:[#allocation5 + $0x314] ss:$8 sps:$4 sm:$0xff]   ;;  %v1300_v15 = vld [vmem:[#allocation5 + $0x310] ss:$8 sps:$4 sm:$0xff]   ;;  %v1305_v16 = vld [vmem:[#allocation5 + $0x224] ss:$8 sps:$4 sm:$0xff]  }
  0x50   :  { %878 = vmatpush1.bf16.msra.mxu0 %v1235_v26  ;;  %v1308_v17 = vld [vmem:[#allocation5 + $0x324] ss:$8 sps:$4 sm:$0xff]   ;;  %v1303_v18 = vld [vmem:[#allocation5 + $0x220] ss:$8 sps:$4 sm:$0xff]   ;;  %v1311_v20 = vld [vmem:[#allocation5 + $0x234] ss:$8 sps:$4 sm:$0xff]   ;;  %p1461_p0 = pnand %p1460_p13, %p1454_p10 }
  0x51   :  { %919 = vmatpush1.bf16.msra.mxu1 %v1236_v27  ;;  %879 = vmatprep.subr.bf16.mxu0 %v1237_v28  ;;  %v1306_v19 = vld [vmem:[#allocation5 + $0x320] ss:$8 sps:$4 sm:$0xff]   ;;  %v1314_v21 = vld [vmem:[#allocation5 + $0x334] ss:$8 sps:$4 sm:$0xff]   ;;  %v1309_v22 = vld [vmem:[#allocation5 + $0x230] ss:$8 sps:$4 sm:$0xff]  }
  0x52   :  { %920 = vmatprep.subr.bf16.mxu1 %v1239_v29  ;;  %v1312_v23 = vld [vmem:[#allocation5 + $0x330] ss:$8 sps:$4 sm:$0xff]   ;;  %v1317_v24 = vld [vmem:[#allocation5 + $0x244] ss:$8 sps:$4 sm:$0xff]   ;;  %v1315_v26 = vld [vmem:[#allocation5 + $0x240] ss:$8 sps:$4 sm:$0xff]  }
  0x53   :  { %v1320_v25 = vld [vmem:[#allocation5 + $0x344] ss:$8 sps:$4 sm:$0xff]   ;;  %v1318_v27 = vld [vmem:[#allocation5 + $0x340] ss:$8 sps:$4 sm:$0xff]   ;;  %v1323_v28 = vld [vmem:[#allocation5 + $0x254] ss:$8 sps:$4 sm:$0xff]  }
  0x54   :  { %880 = vmatpush1.bf16.msra.mxu0 %v1241_v30  ;;  %v1326_v29 = vld [vmem:[#allocation5 + $0x354] ss:$8 sps:$4 sm:$0xff]   ;;  %v1321_v30 = vld [vmem:[#allocation5 + $0x250] ss:$8 sps:$4 sm:$0xff]   ;;  %v1339_v46 = vld [vmem:[#allocation5 + $0x280] ss:$8 sps:$4 sm:$0xff]  }
  0x55   :  { %921 = vmatpush1.bf16.msra.mxu1 %v1242_v31  ;;  %881 = vmatprep.subr.bf16.mxu0 %v1243_v32  ;;  %v1324_v31 = vld [vmem:[#allocation5 + $0x350] ss:$8 sps:$4 sm:$0xff]   ;;  %v1329_v32 = vld [vmem:[#allocation5 + $0x264] ss:$8 sps:$4 sm:$0xff]   ;;  %v1350_v49 = vld [vmem:[#allocation5 + $0x394] ss:$8 sps:$4 sm:$0xff]  }
  0x56   :  { %922 = vmatprep.subr.bf16.mxu1 %v1245_v33  ;;  %v1332_v33 = vld [vmem:[#allocation5 + $0x364] ss:$8 sps:$4 sm:$0xff]   ;;  %v1345_v50 = vld [vmem:[#allocation5 + $0x290] ss:$8 sps:$4 sm:$0xff]  }
  0x57   :  { %v1353_v52 = vld [vmem:[#allocation5 + $0x2a4] ss:$8 sps:$4 sm:$0xff]  }
  0x58   :  { %882 = vmatpush1.bf16.msra.mxu0 %v1247_v34  ;;  %v84_v34 = vld [vmem:[#allocation2 + $0x28] sm:$0xff] }
  0x59   :  { %923 = vmatpush1.bf16.msra.mxu1 %v1248_v35  ;;  %883 = vmatprep.subr.bf16.mxu0 %v1249_v36  ;;  %v94_v35 = vpack.c.bf16 %v84_v34, %v84_v34  ;;  %v86_v36 = vld [vmem:[#allocation2 + $0x38] sm:$0xff]  ;;  %v1377_v4 = vld [vmem:[#allocation5 + $0x2e4] ss:$8 sps:$4 sm:$0xff]  }
  0x5a   :  { %924 = vmatprep.subr.bf16.mxu1 %v1251_v37  ;;  %v1327_v37 = vld [vmem:[#allocation5 + $0x260] ss:$8 sps:$4 sm:$0xff]   ;;  %v1380_v5 = vld [vmem:[#allocation5 + $0x3e4] ss:$8 sps:$4 sm:$0xff]  }
  0x5c   :  { %884 = vmatpush1.bf16.msra.mxu0 %v1253_v38  ;;  %v1330_v38 = vld [vmem:[#allocation5 + $0x360] ss:$8 sps:$4 sm:$0xff]  }
  0x5d   :  { %925 = vmatpush1.bf16.msra.mxu1 %v1254_v39  ;;  %885 = vmatprep.subr.bf16.mxu0 %v1255_v40  ;;  %v96_v39 = vpack.c.bf16 %v86_v36, %v86_v36  ;;  %v1335_v40 = vld [vmem:[#allocation5 + $0x274] ss:$8 sps:$4 sm:$0xff]  }
  0x5e   :  { %926 = vmatprep.subr.bf16.mxu1 %v1257_v41  ;;  %v1338_v41 = vld [vmem:[#allocation5 + $0x374] ss:$8 sps:$4 sm:$0xff]  }
  0x60   :  { %886 = vmatpush1.bf16.msra.mxu0 %v1259_v42  ;;  %v1333_v42 = vld [vmem:[#allocation5 + $0x270] ss:$8 sps:$4 sm:$0xff]  }
  0x61   :  { %927 = vmatpush1.bf16.msra.mxu1 %v1260_v43  ;;  %887 = vmatprep.subr.bf16.mxu0 %v1261_v44  ;;  %v1336_v43 = vld [vmem:[#allocation5 + $0x370] ss:$8 sps:$4 sm:$0xff]   ;;  %v1341_v44 = vld [vmem:[#allocation5 + $0x284] ss:$8 sps:$4 sm:$0xff]  }
  0x62   :  { %928 = vmatprep.subr.bf16.mxu1 %v1263_v45  ;;  %v1344_v45 = vld [vmem:[#allocation5 + $0x384] ss:$8 sps:$4 sm:$0xff]  }
  0x64   :  { %888 = vmatpush1.bf16.msra.mxu0 %v1265_v47  ;;  %v1342_v47 = vld [vmem:[#allocation5 + $0x380] ss:$8 sps:$4 sm:$0xff]  }
  0x65   :  { %929 = vmatpush1.bf16.msra.mxu1 %v1266_v48  ;;  %889 = vmatprep.subr.bf16.mxu0 %v1267_v51  ;;  %v1347_v48 = vld [vmem:[#allocation5 + $0x294] ss:$8 sps:$4 sm:$0xff]   ;;  %v1348_v51 = vld [vmem:[#allocation5 + $0x390] ss:$8 sps:$4 sm:$0xff]  }
  0x66   :  { %930 = vmatprep.subr.bf16.mxu1 %v1269_v53  ;;  %v1356_v53 = vld [vmem:[#allocation5 + $0x3a4] ss:$8 sps:$4 sm:$0xff]  }
  0x68   :  { %890 = vmatpush1.bf16.msra.mxu0 %v1271_v54  ;;  %v1351_v54 = vld [vmem:[#allocation5 + $0x2a0] ss:$8 sps:$4 sm:$0xff]  }
  0x69   :  { %931 = vmatpush1.bf16.msra.mxu1 %v1272_v55  ;;  %891 = vmatprep.subr.bf16.mxu0 %v1273_v56  ;;  %v1354_v55 = vld [vmem:[#allocation5 + $0x3a0] ss:$8 sps:$4 sm:$0xff]   ;;  %v1359_v56 = vld [vmem:[#allocation5 + $0x2b4] ss:$8 sps:$4 sm:$0xff]  }
  0x6a   :  { %932 = vmatprep.subr.bf16.mxu1 %v1275_v57  ;;  %v1362_v57 = vld [vmem:[#allocation5 + $0x3b4] ss:$8 sps:$4 sm:$0xff]  }
  0x6c   :  { %892 = vmatpush1.bf16.msra.mxu0 %v1277_v58  ;;  %v1357_v58 = vld [vmem:[#allocation5 + $0x2b0] ss:$8 sps:$4 sm:$0xff]  }
  0x6d   :  { %933 = vmatpush1.bf16.msra.mxu1 %v1278_v59  ;;  %893 = vmatprep.subr.bf16.mxu0 %v1279_v60  ;;  %v1360_v59 = vld [vmem:[#allocation5 + $0x3b0] ss:$8 sps:$4 sm:$0xff]   ;;  %v1365_v60 = vld [vmem:[#allocation5 + $0x2c4] ss:$8 sps:$4 sm:$0xff]  }
  0x6e   :  { %934 = vmatprep.subr.bf16.mxu1 %v1281_v61  ;;  %v1368_v61 = vld [vmem:[#allocation5 + $0x3c4] ss:$8 sps:$4 sm:$0xff]  }
  0x70   :  { %894 = vmatpush1.bf16.msra.mxu0 %v1283_v62  ;;  %v1363_v62 = vld [vmem:[#allocation5 + $0x2c0] ss:$8 sps:$4 sm:$0xff]  }
  0x71   :  { %935 = vmatpush1.bf16.msra.mxu1 %v1284_v63  ;;  %895 = vmatprep.subr.bf16.mxu0 %v1285_v0  ;;  %v1366_v63 = vld [vmem:[#allocation5 + $0x3c0] ss:$8 sps:$4 sm:$0xff]   ;;  %v1371_v0 = vld [vmem:[#allocation5 + $0x2d4] ss:$8 sps:$4 sm:$0xff]  }
  0x72   :  { %936 = vmatprep.subr.bf16.mxu1 %v1287_v1  ;;  %v1374_v1 = vld [vmem:[#allocation5 + $0x3d4] ss:$8 sps:$4 sm:$0xff]  }
  0x74   :  { %896 = vmatpush1.bf16.msra.mxu0 %v1289_v2  ;;  %v1369_v2 = vld [vmem:[#allocation5 + $0x2d0] ss:$8 sps:$4 sm:$0xff]  }
  0x75   :  { %937 = vmatpush1.bf16.msra.mxu1 %v1290_v3  ;;  %947 = vmatprep.subr.bf16.mxu0 %v1293_v6  ;;  %v1372_v3 = vld [vmem:[#allocation5 + $0x3d0] ss:$8 sps:$4 sm:$0xff]   ;;  %v1375_v6 = vld [vmem:[#allocation5 + $0x2e0] ss:$8 sps:$4 sm:$0xff]  }
  0x76   :  { %988 = vmatprep.subr.bf16.mxu1 %v1296_v7  ;;  %v1378_v7 = vld [vmem:[#allocation5 + $0x3e0] ss:$8 sps:$4 sm:$0xff]  }
  0x77   :  { %898 = vmatmul.mubr.bf16.vlgmr.msra.gmra.mrb[0].mxu0 %v89_v8  ;;  %v1383_v8 = vld [vmem:[#allocation5 + $0x2f4] ss:$8 sps:$4 sm:$0xff]  }
  0x78   :  { %939 = vmatmul.mubr.bf16.vlgmr.msra.gmra.mrb[0].mxu1 %v91_v9  ;;  %948 = vmatpush1.bf16.msra.mxu0 %v1291_v10  ;;  %v1386_v9 = vld [vmem:[#allocation5 + $0x3f4] ss:$8 sps:$4 sm:$0xff]   ;;  %v1381_v10 = vld [vmem:[#allocation5 + $0x2f0] ss:$8 sps:$4 sm:$0xff]  }
  0x79   :  { %989 = vmatpush1.bf16.msra.mxu1 %v1294_v11  ;;  %949 = vmatprep.subr.bf16.mxu0 %v1299_v12  ;;  %v1384_v11 = vld [vmem:[#allocation5 + $0x3f0] ss:$8 sps:$4 sm:$0xff]   ;;  %v83_v12 = vld [vmem:[#allocation2 + $0x20] sm:$0xff] }
  0x7a   :  { %990 = vmatprep.subr.bf16.mxu1 %v1302_v13  ;;  %979 = vmatprep.mubr.bf16.mxu0 %v94_v35  ;;  %v85_v13 = vld [vmem:[#allocation2 + $0x30] sm:$0xff] }
  0x7b   :  { %1020 = vmatprep.mubr.bf16.mxu1 %v96_v39 }
  0x7c   :  { %950 = vmatpush1.bf16.msra.mxu0 %v1297_v14  ;;  %v93_v14 = vpack.c.bf16 %v83_v12, %v83_v12 }
  0x7d   :  { %991 = vmatpush1.bf16.msra.mxu1 %v1300_v15  ;;  %951 = vmatprep.subr.bf16.mxu0 %v1305_v16  ;;  %v95_v15 = vpack.c.bf16 %v85_v13, %v85_v13 }
  0x7e   :  { %992 = vmatprep.subr.bf16.mxu1 %v1308_v17 }
  0x80   :  { %952 = vmatpush1.bf16.msra.mxu0 %v1303_v18 }
  0x81   :  { %993 = vmatpush1.bf16.msra.mxu1 %v1306_v19  ;;  %953 = vmatprep.subr.bf16.mxu0 %v1311_v20 }
  0x82   :  { %994 = vmatprep.subr.bf16.mxu1 %v1314_v21 }
  0x84   :  { %954 = vmatpush1.bf16.msra.mxu0 %v1309_v22 }
  0x85   :  { %995 = vmatpush1.bf16.msra.mxu1 %v1312_v23  ;;  %955 = vmatprep.subr.bf16.mxu0 %v1317_v24 }
  0x86   :  { %996 = vmatprep.subr.bf16.mxu1 %v1320_v25 }
  0x88   :  { %956 = vmatpush1.bf16.msra.mxu0 %v1315_v26  ;;  %v62_v26 = vlaneseq }
  0x89   :  { %997 = vmatpush1.bf16.msra.mxu1 %v1318_v27  ;;  %957 = vmatprep.subr.bf16.mxu0 %v1323_v28 }
  0x8a   :  { %998 = vmatprep.subr.bf16.mxu1 %v1326_v29  ;;  %v63_v27 = vshrl.u32 %v62_v26, 7  ;;  %v60_v29 = vld [vmem:[#allocation7] sm:$0x3] }
  0x8c   :  { %958 = vmatpush1.bf16.msra.mxu0 %v1321_v30  ;;  %v64_v28 = vsub.s32 0, %v63_v27  ;;  %v68_v30 = vsub.s32 1, %v63_v27 }
  0x8d   :  { %999 = vmatpush1.bf16.msra.mxu1 %v1324_v31  ;;  %959 = vmatprep.subr.bf16.mxu0 %v1329_v32 }
  0x8e   :  { %1000 = vmatprep.subr.bf16.mxu1 %v1332_v33  ;;  %v65_v34 = vrot.slane %v60_v29, %v64_v28 }
  0x90   :  { %960 = vmatpush1.bf16.msra.mxu0 %v1327_v37 }
  0x91   :  { %1001 = vmatpush1.bf16.msra.mxu1 %v1330_v38  ;;  %961 = vmatprep.subr.bf16.mxu0 %v1335_v40  ;;  %v69_v38 = vrot.slane %v60_v29, %v68_v30 }
  0x92   :  { %1002 = vmatprep.subr.bf16.mxu1 %v1338_v41 }
  0x94   :  { %962 = vmatpush1.bf16.msra.mxu0 %v1333_v42 }
  0x95   :  { %1003 = vmatpush1.bf16.msra.mxu1 %v1336_v43  ;;  %963 = vmatprep.subr.bf16.mxu0 %v1341_v44 }
  0x96   :  { %1004 = vmatprep.subr.bf16.mxu1 %v1344_v45 }
  0x98   :  { %964 = vmatpush1.bf16.msra.mxu0 %v1339_v46 }
  0x99   :  { %1005 = vmatpush1.bf16.msra.mxu1 %v1342_v47  ;;  %965 = vmatprep.subr.bf16.mxu0 %v1347_v48 }
  0x9a   :  { %1006 = vmatprep.subr.bf16.mxu1 %v1350_v49 }
  0x9c   :  { %966 = vmatpush1.bf16.msra.mxu0 %v1345_v50 }
  0x9d   :  { %1007 = vmatpush1.bf16.msra.mxu1 %v1348_v51  ;;  %967 = vmatprep.subr.bf16.mxu0 %v1353_v52 }
  0x9e   :  { %1008 = vmatprep.subr.bf16.mxu1 %v1356_v53 }
  0xa0   :  { %968 = vmatpush1.bf16.msra.mxu0 %v1351_v54 }
  0xa1   :  { %1009 = vmatpush1.bf16.msra.mxu1 %v1354_v55  ;;  %969 = vmatprep.subr.bf16.mxu0 %v1359_v56 }
  0xa2   :  { %1010 = vmatprep.subr.bf16.mxu1 %v1362_v57 }
  0xa4   :  { %970 = vmatpush1.bf16.msra.mxu0 %v1357_v58 }
  0xa5   :  { %1011 = vmatpush1.bf16.msra.mxu1 %v1360_v59  ;;  %971 = vmatprep.subr.bf16.mxu0 %v1365_v60 }
  0xa6   :  { %1012 = vmatprep.subr.bf16.mxu1 %v1368_v61 }
  0xa8   :  { %972 = vmatpush1.bf16.msra.mxu0 %v1363_v62 }
  0xa9   :  { %1013 = vmatpush1.bf16.msra.mxu1 %v1366_v63  ;;  %973 = vmatprep.subr.bf16.mxu0 %v1371_v0 }
  0xaa   :  { %1014 = vmatprep.subr.bf16.mxu1 %v1374_v1 }
  0xac   :  { %974 = vmatpush1.bf16.msra.mxu0 %v1369_v2 }
  0xad   :  { %1015 = vmatpush1.bf16.msra.mxu1 %v1372_v3  ;;  %975 = vmatprep.subr.bf16.mxu0 %v1377_v4 }
  0xae   :  { %1016 = vmatprep.subr.bf16.mxu1 %v1380_v5 }
  0xb0   :  { %976 = vmatpush1.bf16.msra.mxu0 %v1375_v6 }
  0xb1   :  { %1017 = vmatpush1.bf16.msra.mxu1 %v1378_v7  ;;  %977 = vmatprep.subr.bf16.mxu0 %v1383_v8 }
  0xb2   :  { %1018 = vmatprep.subr.bf16.mxu1 %v1386_v9 }
  0xb4   :  { %978 = vmatpush1.bf16.msra.mxu0 %v1381_v10 }
  0xb5   :  { %1019 = vmatpush1.bf16.msra.mxu1 %v1384_v11 }
  0xb7   :  { %980 = vmatmul.mubr.bf16.vlgmr.msra.gmra.mrb[4].mxu0 %v93_v14 }
  0xb8   :  { %1021 = vmatmul.mubr.bf16.vlgmr.msra.gmra.mrb[4].mxu1 %v95_v15 }
 0x14a   :  { %v899_v16 = vpop.f32.mrb[0].mxu0 }
 0x14b   :  { %v940_v17 = vpop.f32.mrb[0].mxu1  ;;  %v901_v19 = vpop.f32.mrb[1].mxu0 }
 0x14c   :  { %v941_v18 = vadd.f32 %v940_v17, %v899_v16  ;;  %v942_v20 = vpop.f32.mrb[1].mxu1  ;;  %v903_v22 = vpop.f32.mrb[2].mxu0 }
 0x14d   :  { %v943_v21 = vadd.f32 %v942_v20, %v901_v19  ;;  %v944_v23 = vpop.f32.mrb[2].mxu1  ;;  %v904_v24 = vpop.f32.mrb[3].mxu0 }
 0x14e   :  { %v945_v25 = vpop.f32.mrb[3].mxu1 }
 0x18a   :  { %v981_v31 = vpop.f32.mrb[4].mxu0 }
 0x18b   :  { %v1022_v32 = vpop.f32.mrb[4].mxu1  ;;  %v982_v33 = vadd.f32 %v981_v31, %v941_v18  ;;  %v983_v35 = vpop.f32.mrb[5].mxu0 }
 0x18c   :  { %v1024_v36 = vpop.f32.mrb[5].mxu1  ;;  %v984_v37 = vadd.f32 %v983_v35, %v943_v21  ;;  %v985_v39 = vpop.f32.mrb[6].mxu0 }
 0x18d   :  { %v1026_v40 = vpop.f32.mrb[6].mxu1  ;;  %v1023_v41 = vadd.f32 %v1022_v32, %v982_v33  ;;  %v986_v42 = vpop.f32.mrb[7].mxu0 }
 0x18e   :  { %v1027_v43 = vpop.f32.mrb[7].mxu1  ;;  %v1025_v44 = vadd.f32 %v1024_v36, %v984_v37 }
 0x18f   :  { %v1029_v45 = vadd.f32 %v1023_v41, %v65_v34 }
 0x190   :  { %v1030_v46 = vadd.f32 %v1025_v44, %v69_v38 }
 0x191   :  { %v1038_v47 = vmax.f32 %v1029_v45, 0.0 }
 0x192   :  { %v1039_v48 = vmax.f32 %v1030_v46, 0.0 }
 0x193   :  { %1040 = vst [vmem:[#allocation8] sm:$0xff] %v1038_v47 }
 0x194   :  { %1041 = vst [vmem:[#allocation8 + $0x8] sm:$0xff] %v1039_v48 }
 0x195   :  { %1464 = shalt.err (!%p1461_p0)
}
 0x196   :  { %s1465_s25 = scalar_lea.hbm %s1558_s3, 256 }
 0x197   :  { %p1466_p1 = scmp.ne.s32.totalorder %s1558_s3, %s1465_s25  ;;  %p1469_p2 = scmp.lt.u32.totalorder %s1465_s25, %s1558_s3 }
 0x199   :  { %p1471_p3 = pnand %p1469_p2, %p1466_p1 }
 0x19b   :  { %1474 = shalt.err (!%p1471_p3)
}
 0x19c   :  { %1051 = dma.vmem_to_hbm [thread:$0]  %s1049_s21, 256, %s1558_s3, [#allocation4]  }
 0x19d   :  { %1479 = dma.done.wait [#allocation4], 256  }
 0x19e   :  { %1480 = vsyncadd [#allocation4], 4294967040 }
 0x19f   :  { %1055 = vsyncpa [#allocation3], 1 }
 0x1a0   :  { %1056 = vsyncpa [#allocation6], 1 }
 0x1a1   :  { %1057 = vsyncpa [#allocation4], 1 }

</bundles_post_ra>
